<compile_context>
chip_gen: v6e
topology: v6e:2x2x1
jax: 0.10.0
libtpu: 0.0.40
codegen_flags: <defaults>
</compile_context>

<pallas_src>
import jax
import jax.numpy as jnp
from jax import lax
from jax.experimental import pallas as pl
from jax.experimental.pallas import tpu as pltpu


def _round_up(x: int, m: int) -> int:
    return ((x + m - 1) // m) * m


def _make_fcrf_kernel(seq_len: int, t_blk: int, sel_resident: bool):
    """Kernel factory; closes over static loop / tiling parameters."""

    def kernel(emis_ref, sel_ref, bias_ref, out_ref):
        # emis_ref: (t_blk, block_b, K) f32  emissions slab (native T,B,K layout)
        # sel_ref : (T_pad, K, I_pad)   f32  resident one-hot selector   (if sel_resident)
        #           (t_blk, K, I_pad)   f32  per-step selector slab      (otherwise)
        # bias_ref: (1, I_pad)          f32  per-intent path bias (start+trans+end)
        # out_ref : (block_b, I_pad)    f32  scores; VMEM-resident across the T axis
        t = pl.program_id(1)
        t_base = t * t_blk

        @pl.when(t == 0)
        def _():
            out_ref[...] = jnp.broadcast_to(bias_ref[...], out_ref.shape)

        def body(i, acc):
            e = emis_ref[i]  # (block_b, K)
            if seq_len % t_blk != 0:
                # Ragged T tail: mask out-of-range timesteps so stale VMEM
                # garbage (possibly non-finite) cannot contaminate the sum.
                e = jnp.where(t_base + i < seq_len, e, 0.0)
            s = sel_ref[t_base + i] if sel_resident else sel_ref[i]  # (K, I_pad)
            return acc + jnp.dot(e, s, preferred_element_type=jnp.float32)

        acc = lax.fori_loop(
            0, t_blk, body, jnp.zeros(out_ref.shape, jnp.float32), unroll=True
        )
        out_ref[...] += acc

    return kernel


def build_fcrf_tables(sub2intents, start_trans, end_trans, transitions,
                      num_tags, t_pad):
    """Precompute batch-independent tables (hoist out of the hot path).

    Returns:
      sel : (t_pad, K, I_pad) f32  one-hot selector, sel[t, k, j] = [labels[t,j]==k]
      bias: (1, I_pad)        f32  start + path-transition + end score per intent
      I, I_pad
    """
    labels = sub2intents.T  # (T, I) -- matches sub2intents.transpose(0,1) in torch
    T, I = labels.shape
    I_pad = 128 * pl.cdiv(I, 128)  # lane-dense output

    bias = start_trans[labels[0]] + end_trans[labels[T - 1]]
    if T > 1:
        bias = bias + jnp.sum(transitions[labels[:-1], labels[1:]], axis=0)
    bias = jnp.pad(bias.astype(jnp.float32), (0, I_pad - I)).reshape(1, I_pad)

    onehot = jax.nn.one_hot(labels, num_tags, dtype=jnp.float32)  # (T, I, K)
    sel = jnp.transpose(onehot, (0, 2, 1))                        # (T, K, I)
    sel = jnp.pad(sel, ((0, t_pad - T), (0, 0), (0, I_pad - I)))  # (t_pad, K, I_pad)
    return sel, bias, I, I_pad


def fcrf_forward(emissions, sub2intents, start_trans, end_trans, transitions,
                 *, block_b=None, t_blk=None):
    """FCRF.forward for batch_first=False.

    emissions:   (T, B, K) float32 (consumed in its native layout and dtype)
    sub2intents: (I, T)    int32   -- one fixed tag path per intent
    returns:     (B, I)    float32 pred_scores
    """
    T, B, K = emissions.shape

    # --- T blocking (amortize per-grid-step overhead) ---
    if t_blk is None:
        t_blk = 16
    t_blk = max(1, min(t_blk, T))
    t_pad = _round_up(T, t_blk)

    sel, bias, I, I_pad = build_fcrf_tables(
        sub2intents, start_trans, end_trans, transitions, K, t_pad
    )

    # --- batch tiling: >=2 tiles when possible (v7x 2 TCs), cap register use ---
    if block_b is None:
        block_b = min(128, _round_up(pl.cdiv(B, 2), 8))
    if B < 8:
        block_b = B  # full-dim block satisfies the (8,128) tiling rule
    else:
        block_b = min(_round_up(block_b, 8), _round_up(B, 8))

    grid = (pl.cdiv(B, block_b), pl.cdiv(T, t_blk))  # reduction (T) axis last

    # --- selector: VMEM-resident (constant block index) when it fits ---
    sel_bytes = t_pad * K * I_pad * 4
    sel_resident = sel_bytes <= (4 << 20)
    if sel_resident:
        sel_spec = pl.BlockSpec((t_pad, K, I_pad), lambda b, t: (0, 0, 0))
        sel_blk_bytes = sel_bytes
    else:
        sel_spec = pl.BlockSpec((t_blk, K, I_pad), lambda b, t: (t, 0, 0))
        sel_blk_bytes = t_blk * K * I_pad * 4

    # Rough double-buffered VMEM footprint; raise the scoped limit if it grows
    # (v5e's default scoped VMEM is only 16 MiB).
    est_vmem = (2 * t_blk * block_b * K * 4
                + 2 * sel_blk_bytes
                + 2 * block_b * I_pad * 4
                + 2 * 8 * I_pad * 4)
    compiler_kwargs = dict(dimension_semantics=("parallel", "arbitrary"))
    if est_vmem > (10 << 20):
        compiler_kwargs["vmem_limit_bytes"] = int(min(est_vmem + (4 << 20), 48 << 20))

    kernel = _make_fcrf_kernel(T, t_blk, sel_resident)

    out = pl.pallas_call(
        kernel,
        out_shape=jax.ShapeDtypeStruct((B, I_pad), jnp.float32),
        grid_spec=pltpu.PrefetchScalarGridSpec(
            num_scalar_prefetch=0,
            grid=grid,
            in_specs=[
                # emissions in native (T, B, K) layout, f32, T_BLK-deep slabs.
                pl.BlockSpec((t_blk, block_b, K), lambda b, t: (t, b, 0)),
                # one-hot selector (resident full table or per-step slab).
                sel_spec,
                # path bias, same block every step (used only at t == 0).
                pl.BlockSpec((1, I_pad), lambda b, t: (0, 0)),
            ],
            out_specs=pl.BlockSpec((block_b, I_pad), lambda b, t: (b, 0)),
        ),
        compiler_params=pltpu.CompilerParams(**compiler_kwargs),
    )(emissions.astype(jnp.float32), sel, bias)

    return out[:, :I]


def _reference_forward_cls(emissions, sub2intents, start_trans, end_trans, transitions):
    """Pure-JAX mirror of FCRF._forward_cls (PyTorch semantics)."""
    em = jnp.transpose(emissions, (1, 0, 2))  # (B, T, K)
    labels = sub2intents.T                    # (T, I)
    T = labels.shape[0]
    score = start_trans[labels[0]] + em[:, 0, :][:, labels[0]]
    for i in range(1, T):
        score = score + transitions[labels[i - 1], labels[i]]
        score = score + em[:, i, :][:, labels[i]]
    score = score + end_trans[labels[T - 1]]
    return score


if __name__ == "__main__":
    # Small, deterministic shapes: seq_len, batch, num_tags, num_intents.
    T, B, K, I = 8, 4, 8, 6

    key = jax.random.PRNGKey(0)
    k_em, k_start, k_end, k_trans, k_sub = jax.random.split(key, 5)

    emissions = jax.random.normal(k_em, (T, B, K), dtype=jnp.float32)
    start_transitions = jax.random.normal(k_start, (K,), dtype=jnp.float32)
    end_transitions = jax.random.normal(k_end, (K,), dtype=jnp.float32)
    transitions = jax.random.normal(k_trans, (K, K), dtype=jnp.float32)
    sub2intents = jax.random.randint(k_sub, (I, T), 0, K, dtype=jnp.int32)

    pred_scores = fcrf_forward(
        emissions, sub2intents, start_transitions, end_transitions, transitions
    )
    pred_scores = jax.block_until_ready(pred_scores)
    assert pred_scores.shape == (B, I)

    # The MXU may evaluate the f32 matmul at full f32 precision or with bf16
    # input rounding depending on chip/lowering defaults; the one-hot selector
    # is exact either way, so the result must tightly match one of these refs.
    ref_f32 = jax.block_until_ready(_reference_forward_cls(
        emissions, sub2intents, start_transitions, end_transitions, transitions))
    em_bf16 = emissions.astype(jnp.bfloat16).astype(jnp.float32)
    ref_bf16 = jax.block_until_ready(_reference_forward_cls(
        em_bf16, sub2intents, start_transitions, end_transitions, transitions))

    err_f32 = float(jnp.max(jnp.abs(pred_scores - ref_f32)))
    err_bf16 = float(jnp.max(jnp.abs(pred_scores - ref_bf16)))
    assert min(err_f32, err_bf16) < 1e-3, (
        f"mismatch: err vs f32 ref {err_f32}, err vs bf16-rounded ref {err_bf16}"
    )
    assert err_f32 < 0.2, f"far from f32 reference: max abs err {err_f32}"
    print("KERNEL_OK")
</pallas_src>

<mosaic_0001>
module attributes {stable_mosaic.version = 11 : i64} {
  func.func @kernel(%arg0: i32, %arg1: i32, %arg2: memref<8x4x8xf32, #tpu.memory_space<vmem>>, %arg3: memref<8x8x128xf32, #tpu.memory_space<vmem>>, %arg4: memref<1x128xf32, #tpu.memory_space<vmem>>, %arg5: memref<4x128xf32, #tpu.memory_space<vmem>>) attributes {dimension_semantics = [#tpu.dimension_semantics<parallel>, #tpu.dimension_semantics<arbitrary>], iteration_bounds = array<i64: 1, 1>, scalar_prefetch = 0 : i64, scratch_operands = 0 : i64, tpu.core_type = #tpu.core_type<tc>, window_params = [{transform_indices = @transform_0, window_bounds = array<i64: 8, 4, 8>}, {pipeline_mode = #tpu.pipeline_mode<synchronous>, transform_indices = @transform_1, window_bounds = array<i64: 8, 8, 128>}, {pipeline_mode = #tpu.pipeline_mode<synchronous>, transform_indices = @transform_2, window_bounds = array<i64: 1, 128>}, {transform_indices = @transform_3, window_bounds = array<i64: 4, 128>}]} {
    %c8_i32 = arith.constant 8 : i32
    %0 = arith.muli %arg1, %c8_i32 : i32
    %c0_i32 = arith.constant 0 : i32
    %1 = arith.cmpi eq, %arg1, %c0_i32 : i32
    %2 = arith.extui %1 : i1 to i32
    %c0_i32_0 = arith.constant 0 : i32
    %3 = arith.cmpi ne, %2, %c0_i32_0 : i32
    scf.if %3 {
      %c0_46 = arith.constant 0 : index
      %c0_47 = arith.constant 0 : index
      %80 = vector.load %arg4[%c0_46, %c0_47] : memref<1x128xf32, #tpu.memory_space<vmem>>, vector<1x128xf32>
      %81 = vector.shape_cast %80 : vector<1x128xf32> to vector<1x128xf32>
      %82 = vector.broadcast %81 : vector<1x128xf32> to vector<4x128xf32>
      %c0_48 = arith.constant 0 : index
      %c0_49 = arith.constant 0 : index
      %83 = vector.load %arg5[%c0_48, %c0_49] : memref<4x128xf32, #tpu.memory_space<vmem>>, vector<4x128xf32>
      tpu.vector_store %arg5[%c0_48, %c0_49], %82 {strides = array<i32>} : memref<4x128xf32, #tpu.memory_space<vmem>>, vector<4x128xf32>,
    } else {
    }
    %cst = arith.constant 0.000000e+00 : f32
    %4 = vector.broadcast %cst : f32 to vector<4x128xf32>
    %c0_i32_1 = arith.constant 0 : i32
    %5 = arith.index_cast %c0_i32_1 : i32 to index
    %c0 = arith.constant 0 : index
    %c0_2 = arith.constant 0 : index
    %6 = vector.load %arg2[%5, %c0, %c0_2] : memref<8x4x8xf32, #tpu.memory_space<vmem>>, vector<1x4x8xf32>
    %7 = vector.shape_cast %6 : vector<1x4x8xf32> to vector<4x8xf32>
    %8 = arith.addi %0, %c0_i32_1 : i32
    %9 = arith.index_cast %8 : i32 to index
    %c0_3 = arith.constant 0 : index
    %c0_4 = arith.constant 0 : index
    %10 = vector.load %arg3[%9, %c0_3, %c0_4] : memref<8x8x128xf32, #tpu.memory_space<vmem>>, vector<1x8x128xf32>
    %11 = vector.shape_cast %10 : vector<1x8x128xf32> to vector<8x128xf32>
    %cst_5 = arith.constant dense<0.000000e+00> : vector<4x128xf32>
    %12 = tpu.matmul %7, %11, %cst_5 {dimension_numbers = #tpu.dot_dimension_numbers<[1], [0], [0], [1], [0, 0, 1, 1], [], []>} : vector<4x8xf32>, vector<8x128xf32>, vector<4x128xf32> -> vector<4x128xf32>
    %13 = arith.addf %4, %12 : vector<4x128xf32>
    %c1_i32 = arith.constant 1 : i32
    %14 = arith.index_cast %c1_i32 : i32 to index
    %c0_6 = arith.constant 0 : index
    %c0_7 = arith.constant 0 : index
    %15 = vector.load %arg2[%14, %c0_6, %c0_7] : memref<8x4x8xf32, #tpu.memory_space<vmem>>, vector<1x4x8xf32>
    %16 = vector.shape_cast %15 : vector<1x4x8xf32> to vector<4x8xf32>
    %17 = arith.addi %0, %c1_i32 : i32
    %18 = arith.index_cast %17 : i32 to index
    %c0_8 = arith.constant 0 : index
    %c0_9 = arith.constant 0 : index
    %19 = vector.load %arg3[%18, %c0_8, %c0_9] : memref<8x8x128xf32, #tpu.memory_space<vmem>>, vector<1x8x128xf32>
    %20 = vector.shape_cast %19 : vector<1x8x128xf32> to vector<8x128xf32>
    %cst_10 = arith.constant dense<0.000000e+00> : vector<4x128xf32>
    %21 = tpu.matmul %16, %20, %cst_10 {dimension_numbers = #tpu.dot_dimension_numbers<[1], [0], [0], [1], [0, 0, 1, 1], [], []>} : vector<4x8xf32>, vector<8x128xf32>, vector<4x128xf32> -> vector<4x128xf32>
    %22 = arith.addf %13, %21 : vector<4x128xf32>
    %c2_i32 = arith.constant 2 : i32
    %23 = arith.index_cast %c2_i32 : i32 to index
    %c0_11 = arith.constant 0 : index
    %c0_12 = arith.constant 0 : index
    %24 = vector.load %arg2[%23, %c0_11, %c0_12] : memref<8x4x8xf32, #tpu.memory_space<vmem>>, vector<1x4x8xf32>
    %25 = vector.shape_cast %24 : vector<1x4x8xf32> to vector<4x8xf32>
    %26 = arith.addi %0, %c2_i32 : i32
    %27 = arith.index_cast %26 : i32 to index
    %c0_13 = arith.constant 0 : index
    %c0_14 = arith.constant 0 : index
    %28 = vector.load %arg3[%27, %c0_13, %c0_14] : memref<8x8x128xf32, #tpu.memory_space<vmem>>, vector<1x8x128xf32>
    %29 = vector.shape_cast %28 : vector<1x8x128xf32> to vector<8x128xf32>
    %cst_15 = arith.constant dense<0.000000e+00> : vector<4x128xf32>
    %30 = tpu.matmul %25, %29, %cst_15 {dimension_numbers = #tpu.dot_dimension_numbers<[1], [0], [0], [1], [0, 0, 1, 1], [], []>} : vector<4x8xf32>, vector<8x128xf32>, vector<4x128xf32> -> vector<4x128xf32>
    %31 = arith.addf %22, %30 : vector<4x128xf32>
    %c3_i32 = arith.constant 3 : i32
    %32 = arith.index_cast %c3_i32 : i32 to index
    %c0_16 = arith.constant 0 : index
    %c0_17 = arith.constant 0 : index
    %33 = vector.load %arg2[%32, %c0_16, %c0_17] : memref<8x4x8xf32, #tpu.memory_space<vmem>>, vector<1x4x8xf32>
    %34 = vector.shape_cast %33 : vector<1x4x8xf32> to vector<4x8xf32>
    %35 = arith.addi %0, %c3_i32 : i32
    %36 = arith.index_cast %35 : i32 to index
    %c0_18 = arith.constant 0 : index
    %c0_19 = arith.constant 0 : index
    %37 = vector.load %arg3[%36, %c0_18, %c0_19] : memref<8x8x128xf32, #tpu.memory_space<vmem>>, vector<1x8x128xf32>
    %38 = vector.shape_cast %37 : vector<1x8x128xf32> to vector<8x128xf32>
    %cst_20 = arith.constant dense<0.000000e+00> : vector<4x128xf32>
    %39 = tpu.matmul %34, %38, %cst_20 {dimension_numbers = #tpu.dot_dimension_numbers<[1], [0], [0], [1], [0, 0, 1, 1], [], []>} : vector<4x8xf32>, vector<8x128xf32>, vector<4x128xf32> -> vector<4x128xf32>
    %40 = arith.addf %31, %39 : vector<4x128xf32>
    %c4_i32 = arith.constant 4 : i32
    %41 = arith.index_cast %c4_i32 : i32 to index
    %c0_21 = arith.constant 0 : index
    %c0_22 = arith.constant 0 : index
    %42 = vector.load %arg2[%41, %c0_21, %c0_22] : memref<8x4x8xf32, #tpu.memory_space<vmem>>, vector<1x4x8xf32>
    %43 = vector.shape_cast %42 : vector<1x4x8xf32> to vector<4x8xf32>
    %44 = arith.addi %0, %c4_i32 : i32
    %45 = arith.index_cast %44 : i32 to index
    %c0_23 = arith.constant 0 : index
    %c0_24 = arith.constant 0 : index
    %46 = vector.load %arg3[%45, %c0_23, %c0_24] : memref<8x8x128xf32, #tpu.memory_space<vmem>>, vector<1x8x128xf32>
    %47 = vector.shape_cast %46 : vector<1x8x128xf32> to vector<8x128xf32>
    %cst_25 = arith.constant dense<0.000000e+00> : vector<4x128xf32>
    %48 = tpu.matmul %43, %47, %cst_25 {dimension_numbers = #tpu.dot_dimension_numbers<[1], [0], [0], [1], [0, 0, 1, 1], [], []>} : vector<4x8xf32>, vector<8x128xf32>, vector<4x128xf32> -> vector<4x128xf32>
    %49 = arith.addf %40, %48 : vector<4x128xf32>
    %c5_i32 = arith.constant 5 : i32
    %50 = arith.index_cast %c5_i32 : i32 to index
    %c0_26 = arith.constant 0 : index
    %c0_27 = arith.constant 0 : index
    %51 = vector.load %arg2[%50, %c0_26, %c0_27] : memref<8x4x8xf32, #tpu.memory_space<vmem>>, vector<1x4x8xf32>
    %52 = vector.shape_cast %51 : vector<1x4x8xf32> to vector<4x8xf32>
    %53 = arith.addi %0, %c5_i32 : i32
    %54 = arith.index_cast %53 : i32 to index
    %c0_28 = arith.constant 0 : index
    %c0_29 = arith.constant 0 : index
    %55 = vector.load %arg3[%54, %c0_28, %c0_29] : memref<8x8x128xf32, #tpu.memory_space<vmem>>, vector<1x8x128xf32>
    %56 = vector.shape_cast %55 : vector<1x8x128xf32> to vector<8x128xf32>
    %cst_30 = arith.constant dense<0.000000e+00> : vector<4x128xf32>
    %57 = tpu.matmul %52, %56, %cst_30 {dimension_numbers = #tpu.dot_dimension_numbers<[1], [0], [0], [1], [0, 0, 1, 1], [], []>} : vector<4x8xf32>, vector<8x128xf32>, vector<4x128xf32> -> vector<4x128xf32>
    %58 = arith.addf %49, %57 : vector<4x128xf32>
    %c6_i32 = arith.constant 6 : i32
    %59 = arith.index_cast %c6_i32 : i32 to index
    %c0_31 = arith.constant 0 : index
    %c0_32 = arith.constant 0 : index
    %60 = vector.load %arg2[%59, %c0_31, %c0_32] : memref<8x4x8xf32, #tpu.memory_space<vmem>>, vector<1x4x8xf32>
    %61 = vector.shape_cast %60 : vector<1x4x8xf32> to vector<4x8xf32>
    %62 = arith.addi %0, %c6_i32 : i32
    %63 = arith.index_cast %62 : i32 to index
    %c0_33 = arith.constant 0 : index
    %c0_34 = arith.constant 0 : index
    %64 = vector.load %arg3[%63, %c0_33, %c0_34] : memref<8x8x128xf32, #tpu.memory_space<vmem>>, vector<1x8x128xf32>
    %65 = vector.shape_cast %64 : vector<1x8x128xf32> to vector<8x128xf32>
    %cst_35 = arith.constant dense<0.000000e+00> : vector<4x128xf32>
    %66 = tpu.matmul %61, %65, %cst_35 {dimension_numbers = #tpu.dot_dimension_numbers<[1], [0], [0], [1], [0, 0, 1, 1], [], []>} : vector<4x8xf32>, vector<8x128xf32>, vector<4x128xf32> -> vector<4x128xf32>
    %67 = arith.addf %58, %66 : vector<4x128xf32>
    %c7_i32 = arith.constant 7 : i32
    %68 = arith.index_cast %c7_i32 : i32 to index
    %c0_36 = arith.constant 0 : index
    %c0_37 = arith.constant 0 : index
    %69 = vector.load %arg2[%68, %c0_36, %c0_37] : memref<8x4x8xf32, #tpu.memory_space<vmem>>, vector<1x4x8xf32>
    %70 = vector.shape_cast %69 : vector<1x4x8xf32> to vector<4x8xf32>
    %71 = arith.addi %0, %c7_i32 : i32
    %72 = arith.index_cast %71 : i32 to index
    %c0_38 = arith.constant 0 : index
    %c0_39 = arith.constant 0 : index
    %73 = vector.load %arg3[%72, %c0_38, %c0_39] : memref<8x8x128xf32, #tpu.memory_space<vmem>>, vector<1x8x128xf32>
    %74 = vector.shape_cast %73 : vector<1x8x128xf32> to vector<8x128xf32>
    %cst_40 = arith.constant dense<0.000000e+00> : vector<4x128xf32>
    %75 = tpu.matmul %70, %74, %cst_40 {dimension_numbers = #tpu.dot_dimension_numbers<[1], [0], [0], [1], [0, 0, 1, 1], [], []>} : vector<4x8xf32>, vector<8x128xf32>, vector<4x128xf32> -> vector<4x128xf32>
    %76 = arith.addf %67, %75 : vector<4x128xf32>
    %c8_i32_41 = arith.constant 8 : i32
    %c0_42 = arith.constant 0 : index
    %c0_43 = arith.constant 0 : index
    %77 = vector.load %arg5[%c0_42, %c0_43] : memref<4x128xf32, #tpu.memory_space<vmem>>, vector<4x128xf32>
    %78 = arith.addf %77, %76 : vector<4x128xf32>
    %c0_44 = arith.constant 0 : index
    %c0_45 = arith.constant 0 : index
    %79 = vector.load %arg5[%c0_44, %c0_45] : memref<4x128xf32, #tpu.memory_space<vmem>>, vector<4x128xf32>
    tpu.vector_store %arg5[%c0_44, %c0_45], %78 {strides = array<i32>} : memref<4x128xf32, #tpu.memory_space<vmem>>, vector<4x128xf32>,
    return
  }
  func.func @transform_0(%arg0: i32, %arg1: i32) -> (i32, i32, i32) {
    %c0_i32 = arith.constant 0 : i32
    %c0_i32_0 = arith.constant 0 : i32
    return %arg1, %arg0, %c0_i32 : i32, i32, i32
  }
  func.func @transform_1(%arg0: i32, %arg1: i32) -> (i32, i32, i32) {
    %c0_i32 = arith.constant 0 : i32
    %c0_i32_0 = arith.constant 0 : i32
    %c0_i32_1 = arith.constant 0 : i32
    %c0_i32_2 = arith.constant 0 : i32
    return %c0_i32, %c0_i32_0, %c0_i32_1 : i32, i32, i32
  }
  func.func @transform_2(%arg0: i32, %arg1: i32) -> (i32, i32) {
    %c0_i32 = arith.constant 0 : i32
    %c0_i32_0 = arith.constant 0 : i32
    %c0_i32_1 = arith.constant 0 : i32
    return %c0_i32, %c0_i32_0 : i32, i32
  }
  func.func @transform_3(%arg0: i32, %arg1: i32) -> (i32, i32) {
    %c0_i32 = arith.constant 0 : i32
    %c0_i32_0 = arith.constant 0 : i32
    return %arg0, %c0_i32 : i32, i32
  }
}

</mosaic_0001>

<bundles_post_ra>
// kernel: tpu_custom_call.1
= control target key start
LH: loop header
LB: loop body
LE: loop exit
PB: predicated region body
PF: predicated region fallthrough
CT: control target
= control target key end

     0   :  { %8 = vsyncpa [#allocation3], 0  ;;  %s916_s0 = inlined_call_operand.hbm [shape: f32[8,4,8], index: 0, kind: input, shape index: {}]   ;;  %s917_s1 = inlined_call_operand.hbm [shape: f32[8,8,128], index: 1, kind: input, shape index: {}]   ;;  %s918_s2 = inlined_call_operand.vmem [shape: f32[1,128], index: 2, kind: input, shape index: {}]   ;;  %s919_s3 = inlined_call_operand.hbm [shape: f32[4,128], index: 3, kind: output, shape index: {}]  }
   0x1   :  { %9 = vsyncpa [#allocation6], 0 }
   0x2   :  { %10 = vsyncpa [#allocation4], 0  ;;  %s859_s12 = smov [#allocation2]  }
   0x3   :  { %s16_s13 = sshll.u32 %s859_s12, 4  ;;  %s17_s13 = int_to_ptr.vmem [resolvable:$true] %s16_s13 }
   0x4   :  { %s801_s14 = scalar_lea.vmem %s17_s13, 512  ;;  %p806_p1 = scmp.lt.s32.totalorder %s17_s13, %s17_s13 }
   0x5   :  { %p802_p0 = scmp.ne.s32.totalorder %s17_s13, %s801_s14  ;;  %p807_p2 = scmp.lt.s32.totalorder %s801_s14, %s801_s14 }
   0x7   :  { %p808_p3 = por %p807_p2, %p806_p1 }
   0x9   :  { %p809_p4 = pnand %p808_p3, %p802_p0 }
   0xb   :  { %812 = shalt.err (!%p809_p4)
}
   0xc   :  { %s860_s15 = smov 64   ;;  %s861_s16 = smov 4  }
   0xd   :  { %22 = dma.hbm_to_vmem [thread:$0]  %s916_s0, 512, %s17_s13, [#allocation3], %s860_s15, %s860_s15, %s861_s16  }
   0xe   :  { %s862_s19 = smov [#allocation5]  }
   0xf   :  { %s28_s20 = sshll.u32 %s862_s19, 4  ;;  %s29_s20 = int_to_ptr.vmem [resolvable:$true] %s28_s20 }
  0x10   :  { %s821_s21 = scalar_lea.vmem %s29_s20, 1024  ;;  %p826_p6 = scmp.lt.s32.totalorder %s29_s20, %s29_s20 }
  0x11   :  { %p822_p5 = scmp.ne.s32.totalorder %s29_s20, %s821_s21  ;;  %p827_p7 = scmp.lt.s32.totalorder %s821_s21, %s821_s21 }
  0x13   :  { %p828_p8 = por %p827_p7, %p826_p6 }
  0x15   :  { %p829_p9 = pnand %p828_p8, %p822_p5 }
  0x17   :  { %832 = shalt.err (!%p829_p9)
}
  0x18   :  { %s863_s22 = smov 128   ;;  %s864_s23 = smov 8  }
  0x19   :  { %34 = dma.hbm_to_vmem [thread:$0]  %s917_s1, 1024, %s29_s20, [#allocation6], %s863_s22, %s863_s22, %s864_s23  }
  0x1a   :  { %853 = dma.done.wait [#allocation3], 512  }
  0x1b   :  { %854 = vsyncadd [#allocation3], 4294966784 }
  0x1c   :  { %855 = dma.done.wait [#allocation6], 1024  }
  0x1d   :  { %856 = vsyncadd [#allocation6], 4294966272  ;;  %v865_v0 = vmov 0.0   ;;  %vm866_vm0 = vmmov 0   ;;  %vm66_vm1 = vcmask 64512   ;;  %v65_v1 = vld [vmem:[#allocation5 + $0x8] sm:$0xff] }
  0x1e   :  { %744 = vmatprep.subr.mxu0 %v865_v0  ;;  %746 = vmatprep.mubr.msk.f32.mxu0 %vm866_vm0, %v865_v0  ;;  %v61_v2 = vld [vmem:[#allocation2 + $0x4] sm:$0xf]  ;;  %v56_v4 = vld [vmem:[#allocation2] sm:$0xf]  ;;  %v218_v5 = vld [vmem:[#allocation5 + $0x10] sm:$0xff] }
  0x1f   :  { %749 = vmatprep.subr.mxu1 %v865_v0  ;;  %751 = vmatprep.mubr.msk.f32.mxu1 %vm866_vm0, %v865_v0  ;;  %v59_v3 = vld [vmem:[#allocation5] sm:$0xff]  ;;  %v298_v6 = vld [vmem:[#allocation5 + $0x18] sm:$0xff]  ;;  %v214_v7 = vld [vmem:[#allocation2 + $0x8] sm:$0xf] }
  0x20   :  { %745 = vmatpush3.msra.mxu0 %v65_v1  ;;  %750 = vmatpush3.msra.mxu1 %v59_v3  ;;  %v294_v8 = vld [vmem:[#allocation2 + $0xc] sm:$0xf]  ;;  %v378_v9 = vld [vmem:[#allocation5 + $0x20] sm:$0xff]  ;;  %v374_v11 = vld [vmem:[#allocation2 + $0x10] sm:$0xf] }
  0x21   :  { %747 = vmatmul.mubr.msk.f32.vlgmr.msra.gmra.mxu0 %vm66_vm1, %v61_v2  ;;  %754 = vmatprep.subr.mxu0 %v865_v0  ;;  %v458_v10 = vld [vmem:[#allocation5 + $0x28] sm:$0xff]  ;;  %v454_v12 = vld [vmem:[#allocation2 + $0x14] sm:$0xf]  ;;  %v618_v14 = vld [vmem:[#allocation5 + $0x38] sm:$0xff] }
  0x22   :  { %752 = vmatmul.mubr.msk.f32.vlgmr.msra.gmra.mxu1 %vm66_vm1, %v56_v4  ;;  %755 = vmatpush3.msra.mxu0 %v218_v5  ;;  %v538_v13 = vld [vmem:[#allocation5 + $0x30] sm:$0xff]  ;;  %v534_v15 = vld [vmem:[#allocation2 + $0x18] sm:$0xf]  ;;  %v614_v16 = vld [vmem:[#allocation2 + $0x1c] sm:$0xf] }
  0x23   :  { %759 = vmatprep.subr.mxu1 %v865_v0  ;;  %756 = vmatprep.mubr.msk.f32.mxu0 %vm866_vm0, %v865_v0  ;;  %v719_v17 = vld [vmem:[%s918_s2] ss:$0 sm:$0xff]  ;;  %s867_s2 = smov [#allocation7]  }
  0x24   :  { %760 = vmatpush3.msra.mxu1 %v298_v6  ;;  %761 = vmatprep.mubr.msk.f32.mxu1 %vm866_vm0, %v865_v0  ;;  %55 = vst [vmem:[#allocation7] sm:$0xf] %v719_v17  ;;  %s702_s26 = sshll.u32 %s867_s2, 4  ;;  %s703_s26 = int_to_ptr.vmem [resolvable:$true] %s702_s26 }
  0x25   :  { %757 = vmatmul.mubr.msk.f32.vlgmr.msra.gmra.mxu0 %vm66_vm1, %v214_v7  ;;  %764 = vmatprep.subr.mxu0 %v865_v0  ;;  %s833_s27 = scalar_lea.vmem %s703_s26, 64  ;;  %p838_p11 = scmp.lt.s32.totalorder %s703_s26, %s703_s26 }
  0x26   :  { %762 = vmatmul.mubr.msk.f32.vlgmr.msra.gmra.mxu1 %vm66_vm1, %v294_v8  ;;  %765 = vmatpush3.msra.mxu0 %v378_v9  ;;  %p834_p10 = scmp.ne.s32.totalorder %s703_s26, %s833_s27  ;;  %p839_p12 = scmp.lt.s32.totalorder %s833_s27, %s833_s27 }
  0x27   :  { %769 = vmatprep.subr.mxu1 %v865_v0  ;;  %766 = vmatprep.mubr.msk.f32.mxu0 %vm866_vm0, %v865_v0 }
  0x28   :  { %770 = vmatpush3.msra.mxu1 %v458_v10  ;;  %771 = vmatprep.mubr.msk.f32.mxu1 %vm866_vm0, %v865_v0  ;;  %p840_p13 = por %p839_p12, %p838_p11 }
  0x29   :  { %767 = vmatmul.mubr.msk.f32.vlgmr.msra.gmra.mxu0 %vm66_vm1, %v374_v11  ;;  %774 = vmatprep.subr.mxu0 %v865_v0 }
  0x2a   :  { %772 = vmatmul.mubr.msk.f32.vlgmr.msra.gmra.mxu1 %vm66_vm1, %v454_v12  ;;  %775 = vmatpush3.msra.mxu0 %v538_v13  ;;  %p841_p0 = pnand %p840_p13, %p834_p10 }
  0x2b   :  { %779 = vmatprep.subr.mxu1 %v865_v0  ;;  %776 = vmatprep.mubr.msk.f32.mxu0 %vm866_vm0, %v865_v0  ;;  %v693_v38 = vld [vmem:[#allocation7] sm:$0xf] }
  0x2c   :  { %780 = vmatpush3.msra.mxu1 %v618_v14  ;;  %781 = vmatprep.mubr.msk.f32.mxu1 %vm866_vm0, %v865_v0 }
  0x2d   :  { %777 = vmatmul.mubr.msk.f32.vlgmr.msra.gmra.mxu0 %vm66_vm1, %v534_v15 }
  0x2e   :  { %782 = vmatmul.mubr.msk.f32.vlgmr.msra.gmra.mxu1 %vm66_vm1, %v614_v16 }
  0xe1   :  { %v136_v18 = vpop.f32.mrf.mxu0 }
  0xe2   :  { %v209_v19 = vpop.f32.mrf.mxu1 }
  0xe3   :  { %v748_v20 = vpop.f32.mrf.mxu0  ;;  %v210_v21 = vadd.f32 %v209_v19, %v136_v18 }
  0xe4   :  { %v753_v22 = vpop.f32.mrf.mxu1 }
  0xe5   :  { %v288_v23 = vpop.f32.mrf.mxu0 }
  0xe6   :  { %v292_v24 = vadd.f32 %v288_v23, %v210_v21  ;;  %v368_v25 = vpop.f32.mrf.mxu1 }
  0xe7   :  { %v758_v26 = vpop.f32.mrf.mxu0 }
  0xe8   :  { %v372_v27 = vadd.f32 %v368_v25, %v292_v24  ;;  %v763_v28 = vpop.f32.mrf.mxu1 }
  0xe9   :  { %v448_v29 = vpop.f32.mrf.mxu0 }
  0xea   :  { %v452_v30 = vadd.f32 %v448_v29, %v372_v27  ;;  %v528_v31 = vpop.f32.mrf.mxu1 }
  0xeb   :  { %v768_v32 = vpop.f32.mrf.mxu0 }
  0xec   :  { %v532_v33 = vadd.f32 %v528_v31, %v452_v30  ;;  %v773_v34 = vpop.f32.mrf.mxu1 }
  0xed   :  { %v608_v35 = vpop.f32.mrf.mxu0 }
  0xee   :  { %v612_v36 = vadd.f32 %v608_v35, %v532_v33  ;;  %v688_v37 = vpop.f32.mrf.mxu1 }
  0xef   :  { %v778_v39 = vpop.f32.mrf.mxu0 }
  0xf0   :  { %v692_v40 = vadd.f32 %v688_v37, %v612_v36  ;;  %v783_v41 = vpop.f32.mrf.mxu1 }
  0xf2   :  { %v694_v42 = vadd.f32 %v693_v38, %v692_v40 }
  0xf4   :  { %695 = vst [vmem:[#allocation7] sm:$0xf] %v694_v42 }
  0xf5   :  { %844 = shalt.err (!%p841_p0)
}
  0xf6   :  { %705 = dma.vmem_to_hbm [thread:$0]  %s703_s26, 64, %s919_s3, [#allocation4]  }
  0xf7   :  { %857 = dma.done.wait [#allocation4], 64  }
  0xf8   :  { %858 = vsyncadd [#allocation4], 4294967232 }
  0xf9   :  { %709 = vsyncpa [#allocation3], 1 }
  0xfa   :  { %710 = vsyncpa [#allocation6], 1 }
  0xfb   :  { %711 = vsyncpa [#allocation4], 1 }

</bundles_post_ra>
